<compile_context>
chip_gen: v6e
topology: v6e:2x2x1
jax: 0.10.0
libtpu: 0.0.40
codegen_flags: <defaults>
</compile_context>

<pallas_src>
import functools

import jax
import jax.numpy as jnp
from jax import lax
from jax.experimental import pallas as pl
from jax.experimental.pallas import tpu as pltpu

_LANE = 128
_VMEM_LIMIT_BYTES = 48 * 1024 * 1024   # < 64 MiB physical VMEM/TC on v7x


# ----------------------------------------------------------------------------
# Tile sizing helpers
# ----------------------------------------------------------------------------
def _choose_tk(m, k, itemsize):
    """Largest lane-aligned K tile such that two double-buffered (M, TK)
    feature tiles + the f32 (M, M) accumulator + a resident f32 target fit a
    conservative, cross-generation VMEM budget."""
    try:
        phys = pltpu.get_tpu_info().vmem_capacity_bytes
    except Exception:
        phys = 64 * 1024 * 1024           # assume the smallest (v7x) if unknown
    budget = min(phys // 2, 40 * 1024 * 1024)
    fixed = 2 * m * m * 4                 # f32 accumulator + resident f32 target
    per_col = 2 * m * itemsize            # one double-buffered feature column
    avail = max(budget - fixed, per_col * _LANE)
    tk = max(_LANE, (avail // per_col) // _LANE * _LANE)
    k_pad = pl.cdiv(k, _LANE) * _LANE
    return int(min(tk, k_pad))


def _pad_lastdim(feats, tk):
    """Zero-pad the contraction dim to a multiple of tk (F @ F.T unchanged)."""
    m, k = feats.shape
    k_pad = pl.cdiv(k, tk) * tk
    if k_pad != k:
        feats = jnp.pad(feats, ((0, 0), (0, k_pad - k)))
    return feats, k_pad


# ----------------------------------------------------------------------------
# Kernels
# ----------------------------------------------------------------------------
def _gram_kernel(feat_ref, g_ref, acc_ref, *, inv_norm):
    """Accumulate F_k @ F_k.T over K tiles; scale once at the last step."""
    k = pl.program_id(0)

    @pl.when(k == 0)
    def _():
        acc_ref[...] = jnp.zeros_like(acc_ref)

    f = feat_ref[...]                                # native dtype, no upcast
    acc_ref[...] += lax.dot_general(                 # contract last dims: no f.T
        f, f,
        dimension_numbers=(((1,), (1,)), ((), ())),
        preferred_element_type=jnp.float32)

    @pl.when(k == pl.num_programs(0) - 1)
    def _():
        g_ref[...] = acc_ref[...] * inv_norm


def _style_loss_kernel(feat_ref, tgt_ref, loss_ref, acc_ref, *, inv_norm, inv_mm):
    """Fused gram + MSE: accumulate partials; epilogue does scale/diff/sum."""
    k = pl.program_id(0)

    @pl.when(k == 0)
    def _():
        acc_ref[...] = jnp.zeros_like(acc_ref)

    f = feat_ref[...]
    acc_ref[...] += lax.dot_general(
        f, f,
        dimension_numbers=(((1,), (1,)), ((), ())),
        preferred_element_type=jnp.float32)

    @pl.when(k == pl.num_programs(0) - 1)
    def _():
        g = acc_ref[...] * inv_norm
        diff = g - tgt_ref[...].astype(jnp.float32)
        loss_ref[0, 0] = jnp.sum(diff * diff) * inv_mm


# ----------------------------------------------------------------------------
# Wrappers
# ----------------------------------------------------------------------------
def gram_matrix(x, *, tk=None):
    """Pallas equivalent of the PyTorch gram_matrix helper. x is NCHW."""
    a, b, c, d = x.shape
    m, k = a * b, c * d
    inv_norm = 1.0 / float(a * b * c * d)
    itemsize = jnp.dtype(x.dtype).itemsize
    if tk is None:
        tk = _choose_tk(m, k, itemsize)
    feats, k_pad = _pad_lastdim(x.reshape(m, k), tk)
    n_steps = k_pad // tk
    return pl.pallas_call(
        functools.partial(_gram_kernel, inv_norm=inv_norm),
        out_shape=jax.ShapeDtypeStruct((m, m), jnp.float32),
        grid=(n_steps,),
        in_specs=[pl.BlockSpec((m, tk), lambda kk: (0, kk))],
        out_specs=pl.BlockSpec((m, m), lambda kk: (0, 0)),
        scratch_shapes=[pltpu.VMEM((m, m), jnp.float32)],
        compiler_params=pltpu.CompilerParams(
            dimension_semantics=("arbitrary",),
            vmem_limit_bytes=_VMEM_LIMIT_BYTES),
        cost_estimate=pl.CostEstimate(
            flops=2 * m * m * k_pad,
            transcendentals=0,
            bytes_accessed=m * k_pad * itemsize + m * m * 4),
    )(feats)


@functools.partial(jax.jit, static_argnames=("tk",))
def _style_loss(x, target, *, tk):
    """loss = mean((gram(x) - target)^2) with the gram + MSE fused in-kernel."""
    a, b, c, d = x.shape
    m, k = a * b, c * d
    inv_norm = 1.0 / float(a * b * c * d)
    itemsize = jnp.dtype(x.dtype).itemsize
    feats, k_pad = _pad_lastdim(x.reshape(m, k), tk)
    n_steps = k_pad // tk
    loss = pl.pallas_call(
        functools.partial(_style_loss_kernel, inv_norm=inv_norm,
                          inv_mm=1.0 / float(m * m)),
        out_shape=jax.ShapeDtypeStruct((1, 1), jnp.float32),
        grid=(n_steps,),
        in_specs=[
            pl.BlockSpec((m, tk), lambda kk: (0, kk)),
            pl.BlockSpec((m, m), lambda kk: (0, 0)),
        ],
        out_specs=pl.BlockSpec(memory_space=pltpu.SMEM),
        scratch_shapes=[pltpu.VMEM((m, m), jnp.float32)],
        compiler_params=pltpu.CompilerParams(
            dimension_semantics=("arbitrary",),
            vmem_limit_bytes=_VMEM_LIMIT_BYTES),
        cost_estimate=pl.CostEstimate(
            flops=2 * m * m * k_pad,
            transcendentals=0,
            bytes_accessed=m * k_pad * itemsize + m * m * 4 + 4),
    )(feats, target)
    return loss[0, 0]


class StyleLoss:
    """JAX/Pallas port of the PyTorch StyleLoss module."""

    def __init__(self, target_feature):
        # fixed buffer ("detach" == stop_gradient here)
        self.target = lax.stop_gradient(gram_matrix(target_feature))

    def forward(self, x):
        a, b, c, d = x.shape
        tk = _choose_tk(a * b, c * d, jnp.dtype(x.dtype).itemsize)
        self.loss = _style_loss(x, self.target, tk=tk)
        # forward returns the input unchanged (pass-through module)
        return x

    __call__ = forward


# ----------------------------------------------------------------------------
# Reference (plain JAX) for verification
# ----------------------------------------------------------------------------
def _gram_ref(x):
    a, b, c, d = x.shape
    f = x.reshape(a * b, c * d).astype(jnp.float32)
    return (f @ f.T) / (a * b * c * d)


if __name__ == "__main__":
    key = jax.random.PRNGKey(0)
    k_tgt, k_in = jax.random.split(key)

    # small NCHW shapes consistent with the module: batch=2, channels=4, 16x16
    target_feature = jax.random.normal(k_tgt, (2, 4, 16, 16), dtype=jnp.float32)
    x = jax.random.normal(k_in, (2, 4, 16, 16), dtype=jnp.float32)

    module = StyleLoss(target_feature)
    out = jax.block_until_ready(module(x))
    loss = jax.block_until_ready(module.loss)

    # plain-JAX reference
    g_ref = _gram_ref(x)
    t_ref = _gram_ref(target_feature)
    loss_ref = jnp.mean((g_ref - t_ref) ** 2)

    assert out.shape == x.shape and jnp.allclose(out, x), \
        "forward must pass input through"
    assert jnp.allclose(loss, loss_ref, rtol=1e-5, atol=1e-6), (loss, loss_ref)

    # explicitly exercise the multi-tile K-accumulation path (TK=128 -> 2 steps)
    g_tiled = jax.block_until_ready(gram_matrix(x, tk=128))
    loss_tiled = jax.block_until_ready(_style_loss(x, module.target, tk=128))
    assert jnp.allclose(g_tiled, g_ref, rtol=1e-5, atol=1e-6)
    assert jnp.allclose(loss_tiled, loss_ref, rtol=1e-5, atol=1e-6), \
        (loss_tiled, loss_ref)

    print("KERNEL_OK")
</pallas_src>

<mosaic_0001>
module attributes {stable_mosaic.version = 11 : i64} {
  func.func @_gram_kernel(%arg0: i32, %arg1: memref<8x256xf32, #tpu.memory_space<vmem>>, %arg2: memref<8x8xf32, #tpu.memory_space<vmem>>, %arg3: memref<8x8xf32, #tpu.memory_space<vmem>>) attributes {dimension_semantics = [#tpu.dimension_semantics<arbitrary>], iteration_bounds = array<i64: 1>, scalar_prefetch = 0 : i64, scratch_operands = 1 : i64, tpu.core_type = #tpu.core_type<tc>, window_params = [{transform_indices = @transform_0, window_bounds = array<i64: 8, 256>}, {pipeline_mode = #tpu.pipeline_mode<synchronous>, transform_indices = @transform_1, window_bounds = array<i64: 8, 8>}]} {
    %c0_i32 = arith.constant 0 : i32
    %0 = arith.cmpi eq, %arg0, %c0_i32 : i32
    %1 = arith.extui %0 : i1 to i32
    %c0_i32_0 = arith.constant 0 : i32
    %2 = arith.cmpi ne, %1, %c0_i32_0 : i32
    scf.if %2 {
      %cst_8 = arith.constant 0.000000e+00 : f32
      %11 = vector.broadcast %cst_8 : f32 to vector<8x8xf32>
      %c0_9 = arith.constant 0 : index
      %c0_10 = arith.constant 0 : index
      %12 = vector.load %arg3[%c0_9, %c0_10] : memref<8x8xf32, #tpu.memory_space<vmem>>, vector<8x8xf32>
      tpu.vector_store %arg3[%c0_9, %c0_10], %11 {strides = array<i32>} : memref<8x8xf32, #tpu.memory_space<vmem>>, vector<8x8xf32>,
    } else {
    }
    %c0 = arith.constant 0 : index
    %c0_1 = arith.constant 0 : index
    %3 = vector.load %arg1[%c0, %c0_1] : memref<8x256xf32, #tpu.memory_space<vmem>>, vector<8x256xf32>
    %c0_2 = arith.constant 0 : index
    %c0_3 = arith.constant 0 : index
    %4 = vector.load %arg3[%c0_2, %c0_3] : memref<8x8xf32, #tpu.memory_space<vmem>>, vector<8x8xf32>
    %cst = arith.constant dense<0.000000e+00> : vector<8x8xf32>
    %5 = tpu.matmul %3, %3, %cst {dimension_numbers = #tpu.dot_dimension_numbers<[1], [1], [0], [0], [0, 0, 1, 0], [], []>} : vector<8x256xf32>, vector<8x256xf32>, vector<8x8xf32> -> vector<8x8xf32>
    %6 = arith.addf %4, %5 : vector<8x8xf32>
    %c0_4 = arith.constant 0 : index
    %c0_5 = arith.constant 0 : index
    %7 = vector.load %arg3[%c0_4, %c0_5] : memref<8x8xf32, #tpu.memory_space<vmem>>, vector<8x8xf32>
    tpu.vector_store %arg3[%c0_4, %c0_5], %6 {strides = array<i32>} : memref<8x8xf32, #tpu.memory_space<vmem>>, vector<8x8xf32>,
    %c0_i32_6 = arith.constant 0 : i32
    %8 = arith.cmpi eq, %arg0, %c0_i32_6 : i32
    %9 = arith.extui %8 : i1 to i32
    %c0_i32_7 = arith.constant 0 : i32
    %10 = arith.cmpi ne, %9, %c0_i32_7 : i32
    scf.if %10 {
      %c0_8 = arith.constant 0 : index
      %c0_9 = arith.constant 0 : index
      %11 = vector.load %arg3[%c0_8, %c0_9] : memref<8x8xf32, #tpu.memory_space<vmem>>, vector<8x8xf32>
      %cst_10 = arith.constant 4.8828125E-4 : f32
      %12 = vector.broadcast %cst_10 : f32 to vector<8x8xf32>
      %13 = arith.mulf %11, %12 : vector<8x8xf32>
      %c0_11 = arith.constant 0 : index
      %c0_12 = arith.constant 0 : index
      %14 = vector.load %arg2[%c0_11, %c0_12] : memref<8x8xf32, #tpu.memory_space<vmem>>, vector<8x8xf32>
      tpu.vector_store %arg2[%c0_11, %c0_12], %13 {strides = array<i32>} : memref<8x8xf32, #tpu.memory_space<vmem>>, vector<8x8xf32>,
    } else {
    }
    return
  }
  func.func @transform_0(%arg0: i32) -> (i32, i32) {
    %c0_i32 = arith.constant 0 : i32
    %c0_i32_0 = arith.constant 0 : i32
    return %c0_i32, %arg0 : i32, i32
  }
  func.func @transform_1(%arg0: i32) -> (i32, i32) {
    %c0_i32 = arith.constant 0 : i32
    %c0_i32_0 = arith.constant 0 : i32
    %c0_i32_1 = arith.constant 0 : i32
    return %c0_i32, %c0_i32_0 : i32, i32
  }
}

</mosaic_0001>

<bundles_post_ra>
// kernel: tpu_custom_call.1
= control target key start
LH: loop header
LB: loop body
LE: loop exit
PB: predicated region body
PF: predicated region fallthrough
CT: control target
= control target key end

     0   :  { %6 = vsyncpa [#allocation4], 0  ;;  %s193_s0 = inlined_call_operand.hbm [shape: f32[8,256], index: 0, kind: input, shape index: {}]   ;;  %s194_s1 = inlined_call_operand.hbm [shape: f32[8,8], index: 1, kind: output, shape index: {}]  }
   0x1   :  { %7 = vsyncpa [#allocation5], 0  ;;  %s171_s6 = smov [#allocation3]  }
   0x2   :  { %s14_s7 = sshll.u32 %s171_s6, 4  ;;  %s15_s7 = int_to_ptr.vmem [resolvable:$true] %s14_s7 }
   0x3   :  { %s135_s8 = scalar_lea.vmem %s15_s7, 256  ;;  %p140_p1 = scmp.lt.s32.totalorder %s15_s7, %s15_s7 }
   0x4   :  { %p136_p0 = scmp.ne.s32.totalorder %s15_s7, %s135_s8  ;;  %p141_p2 = scmp.lt.s32.totalorder %s135_s8, %s135_s8 }
   0x6   :  { %p142_p3 = por %p141_p2, %p140_p1 }
   0x8   :  { %p143_p4 = pnand %p142_p3, %p136_p0 }
   0xa   :  { %146 = shalt.err (!%p143_p4)
}
   0xb   :  { %17 = dma.hbm_to_vmem [thread:$0]  %s193_s0, 256, %s15_s7, [#allocation4]  }
   0xc   :  { %167 = dma.done.wait [#allocation4], 256  }
   0xd   :  { %168 = vsyncadd [#allocation4], 4294967040  ;;  %vm25_vm0 = vcmask 64512   ;;  %v172_v0 = vmov 0.0   ;;  %v28_v1 = vld [vmem:[#allocation3 + $0x8] sm:$0xff]  ;;  %v27_v2 = vld [vmem:[#allocation3] sm:$0xff] }
   0xe   :  { %26 = vst.msk [vmem:[#allocation2] sm:$0xff] %vm25_vm0, %v172_v0  ;;  %60 = vmatprep.subr.mxu0 %v28_v1  ;;  %94 = vmatprep.mubr.f32.mxu0 %v28_v1  ;;  %s173_s11 = smov [#allocation6]  }
   0xf   :  { %61 = vmatpush1.xpose.msra.mxu0 %v27_v2  ;;  %s115_s0 = sshll.u32 %s173_s11, 4  ;;  %s116_s0 = int_to_ptr.vmem [resolvable:$true] %s115_s0 }
  0x10   :  { %s147_s12 = scalar_lea.vmem %s116_s0, 128  ;;  %p152_p6 = scmp.lt.s32.totalorder %s116_s0, %s116_s0 }
  0x11   :  { %p148_p5 = scmp.ne.s32.totalorder %s116_s0, %s147_s12  ;;  %p153_p7 = scmp.lt.s32.totalorder %s147_s12, %s147_s12 }
  0x12   :  { %95 = vmatmul.mubr.f32.vlgmr.msra.gmra.mxu0 %v27_v2 }
  0x13   :  { %p154_p8 = por %p153_p7, %p152_p6 }
  0x15   :  { %v29_v3 = vld [vmem:[#allocation2] sm:$0xff]  ;;  %p155_p9 = pnand %p154_p8, %p148_p5 }
  0xd2   :  { %v96_v4 = vpop.f32.mrf.mxu0 }
  0xd3   :  { %v100_v5 = vadd.f32 %v96_v4, %v29_v3 }
  0xd4   :  { %v98_v6 = vpop.f32.mrf.mxu0 }
  0xd5   :  { %102 = vst.msk [vmem:[#allocation2] sm:$0xff] %vm25_vm0, %v100_v5 }
  0xdc   :  { %v106_v7 = vld [vmem:[#allocation2] sm:$0xff] }
  0xdd   :  { %v107_v8 = vmul.f32 0.00048828125, %v106_v7 }
  0xdf   :  { %108 = vst.msk [vmem:[#allocation6] sm:$0xff] %vm25_vm0, %v107_v8 }
  0xe0   :  { %158 = shalt.err (!%p155_p9)
}
  0xe1   :  { %118 = dma.vmem_to_hbm [thread:$0]  %s116_s0, 128, %s194_s1, [#allocation5]  }
  0xe2   :  { %169 = dma.done.wait [#allocation5], 128  }
  0xe3   :  { %170 = vsyncadd [#allocation5], 4294967168 }
  0xe4   :  { %122 = vsyncpa [#allocation4], 1 }
  0xe5   :  { %123 = vsyncpa [#allocation5], 1 }

</bundles_post_ra>
